<compile_context>
chip_gen: v5e
topology: v5e:2x2
jax: 0.10.0
libtpu: 0.0.40
codegen_flags: <defaults>
</compile_context>

<pallas_src>
import functools
import math

import jax
import jax.numpy as jnp
from jax import lax
from jax.experimental import pallas as pl
from jax.experimental.pallas import tpu as pltpu

_LANES = 128


def _softplus(z):
    # Stable softplus built only from exp/log/abs/max (all supported on VPU/EUP).
    return jnp.maximum(z, 0.0) + jnp.log(1.0 + jnp.exp(-jnp.abs(z)))


def _vmem_limit_bytes():
    cap = 64 * 1024 * 1024  # conservative fallback (v7x physical VMEM)
    try:
        cap = int(getattr(pltpu.get_tpu_info(), "vmem_capacity_bytes", cap))
    except Exception:
        pass
    # Half the physical VMEM, never above 64 MiB: 64 MiB on v5e/v6e, 32 MiB on v7x.
    return min(cap // 2, 64 * 1024 * 1024)


def _spatial_tile(hw, num_classes, vmem_limit):
    """Pick a lane-tile over the flattened spatial axis and the padded extent."""
    budget = vmem_limit // 8                 # f32 bytes for one logits compute tile
    max_t = budget // (num_classes * 4)
    max_t = min(max_t, 32768)                # keep gt/iota temps bounded
    max_t = max(128, (max_t // 128) * 128)
    if hw <= max_t:
        return hw, hw                        # single tile (block == full extent)
    hw_pad = ((hw + max_t - 1) // max_t) * max_t
    return max_t, hw_pad


def _image_level_loss_kernel(logits_ref, gts_ref, out_ref,
                             m_ref, s_ref, present_ref,
                             *, k, norm, hw, tile, num_classes, masked):
    s_idx = pl.program_id(1)
    ns = pl.num_programs(1)

    @pl.when(s_idx == 0)
    def _init():
        m_ref[...] = jnp.full((num_classes, 1), -jnp.inf, jnp.float32)
        s_ref[...] = jnp.zeros((num_classes, 1), jnp.float32)
        present_ref[...] = jnp.zeros((num_classes, 1), jnp.float32)

    x = logits_ref[0].astype(jnp.float32)                     # (C, T)

    if norm:
        # softmax over the class axis (per pixel), matching F.softmax(logits, dim=1)
        xm = jnp.max(x, axis=0, keepdims=True)                # (1, T)
        ex = jnp.exp(x - xm)
        inv_den = pl.reciprocal(jnp.sum(ex, axis=0, keepdims=True), approx=True)
        x = ex * inv_den

    if k != 1.0:                                              # k is a trace-time const
        x = k * x

    if masked:
        # Only emitted when the spatial axis had to be padded to a tile multiple.
        col = lax.broadcasted_iota(jnp.int32, (num_classes, tile), 1)
        valid = (s_idx * tile + col) < hw
        x = jnp.where(valid, x, -1e30)                        # exp() underflows to 0

    # ---- online logsumexp over the spatial axis ----
    tile_m = jnp.max(x, axis=-1, keepdims=True)               # (C, 1)
    m_prev = m_ref[...]
    m_new = jnp.maximum(m_prev, tile_m)
    s_ref[...] = (s_ref[...] * jnp.exp(m_prev - m_new)
                  + jnp.sum(jnp.exp(x - m_new), axis=-1, keepdims=True))
    m_ref[...] = m_new

    # ---- class-presence OR over the spatial axis ----
    # labels outside [0, C) (255 ignore label, -1 padding) never match the iota.
    g = gts_ref[0]                                            # (1, T) int32
    ids = lax.broadcasted_iota(jnp.int32, (num_classes, tile), 0)
    tile_present = jnp.max((g == ids).astype(jnp.float32),
                           axis=-1, keepdims=True)            # (C, 1)
    present_ref[...] = jnp.maximum(present_ref[...], tile_present)

    @pl.when(s_idx == ns - 1)
    def _finalize():
        # log-mean-exp over exactly hw pixels, then /k
        lse = m_ref[...] + jnp.log(s_ref[...]) + math.log(1.0 / hw)   # (C, 1)
        if k != 1.0:
            lse = lse / k
        # log(sigmoid(z)) = -softplus(-z); log(1-sigmoid(z)) = -softplus(z)
        # (clamped at -100 to match torch.nn.functional.binary_cross_entropy)
        log_pt = jnp.maximum(-_softplus(-lse), -100.0)
        log_1mpt = jnp.maximum(-_softplus(lse), -100.0)
        cls = present_ref[...]
        bce = -(cls * log_pt + (1.0 - cls) * log_1mpt)        # (C, 1)
        out_ref[...] = jnp.broadcast_to(bce[None, :, :],
                                        (1, num_classes, _LANES))


def image_level_loss2(logits, gts, k=1.0, norm=False):
    """logits: (B, C, H, W) float (f32 or bf16); gts: (B, H, W) int labels (255 = ignore)."""
    B, C, H, W = logits.shape
    hw = H * W
    vmem_limit = _vmem_limit_bytes()
    tile, hw_pad = _spatial_tile(hw, C, vmem_limit)
    ns = hw_pad // tile
    masked = hw_pad != hw

    # Keep the original logits dtype (cast to f32 happens inside the kernel).
    logits_flat = logits.reshape(B, C, hw)
    # TODO(synk): gts kept as int32 (could stream as int8 to shave ~10% HBM traffic).
    gts_flat = gts.reshape(B, 1, hw).astype(jnp.int32)
    if masked:
        pad = hw_pad - hw
        logits_flat = jnp.pad(logits_flat, ((0, 0), (0, 0), (0, pad)))
        gts_flat = jnp.pad(gts_flat, ((0, 0), (0, 0), (0, pad)),
                           constant_values=-1)

    kernel = functools.partial(
        _image_level_loss_kernel, k=float(k), norm=bool(norm), hw=hw,
        tile=tile, num_classes=C, masked=masked)

    partial = pl.pallas_call(
        kernel,
        out_shape=jax.ShapeDtypeStruct((B, C, _LANES), jnp.float32),
        grid_spec=pltpu.PrefetchScalarGridSpec(
            num_scalar_prefetch=0,
            grid=(B, ns),
            in_specs=[
                pl.BlockSpec((1, C, tile), lambda b, s: (b, 0, s)),
                pl.BlockSpec((1, 1, tile), lambda b, s: (b, 0, s)),
            ],
            out_specs=pl.BlockSpec((1, C, _LANES), lambda b, s: (b, 0, 0)),
            scratch_shapes=[
                pltpu.VMEM((C, 1), jnp.float32),   # running max (per class)
                pltpu.VMEM((C, 1), jnp.float32),   # running scaled exp-sum
                pltpu.VMEM((C, 1), jnp.float32),   # running class presence
            ],
        ),
        compiler_params=pltpu.CompilerParams(
            dimension_semantics=("parallel", "arbitrary"),
            vmem_limit_bytes=vmem_limit),
    )(logits_flat, gts_flat)

    # mean over B * C (matches F.binary_cross_entropy's mean reduction)
    return jnp.sum(partial[:, :, 0]) / (B * C)


def _reference(logits, gts, k=1.0, norm=False):
    """Plain-JAX reference mirroring the PyTorch forward."""
    B, C, H, W = logits.shape
    x = logits.astype(jnp.float32)
    if norm:
        x = jax.nn.softmax(x, axis=1)
    xf = x.reshape(B, C, -1) * k
    lse = jax.scipy.special.logsumexp(xf, axis=2)
    lse = (jnp.log(1.0 / xf.shape[-1]) + lse) / k
    pt = jax.nn.sigmoid(lse)
    g = gts.reshape(B, -1)
    present = (g[:, None, :] == jnp.arange(C)[None, :, None]).any(-1)
    classes = present.astype(jnp.float32)
    bce = -(classes * jnp.log(pt) + (1.0 - classes) * jnp.log(1.0 - pt))
    return bce.mean()


if __name__ == "__main__":
    key = jax.random.PRNGKey(0)
    k1, k2, k3 = jax.random.split(key, 3)

    B, C, H, W = 2, 19, 16, 16          # 19 classes (Cityscapes convention)
    logits = jax.random.normal(k1, (B, C, H, W), dtype=jnp.float32)
    gts = jax.random.randint(k2, (B, H, W), 0, C).astype(jnp.int32)
    ignore = jax.random.bernoulli(k3, 0.1, (B, H, W))
    gts = jnp.where(ignore, jnp.int32(255), gts)      # sprinkle ignore labels

    # norm=False, f32 streaming
    loss = jax.block_until_ready(image_level_loss2(logits, gts, k=1.0, norm=False))
    ref = _reference(logits, gts, k=1.0, norm=False)
    assert jnp.allclose(loss, ref, atol=1e-5, rtol=1e-5), (loss, ref)

    # norm=True path with bf16 streaming (cast + softmax happen in-kernel;
    # looser tolerance because of the approx EUP reciprocal)
    logits_bf16 = logits.astype(jnp.bfloat16)
    loss_n = jax.block_until_ready(image_level_loss2(logits_bf16, gts, k=1.0, norm=True))
    ref_n = _reference(logits_bf16.astype(jnp.float32), gts, k=1.0, norm=True)
    assert jnp.allclose(loss_n, ref_n, atol=2e-3, rtol=2e-3), (loss_n, ref_n)

    print("KERNEL_OK")
</pallas_src>

<mosaic_0001>
module attributes {stable_mosaic.version = 11 : i64} {
  func.func @_image_level_loss_kernel(%arg0: i32, %arg1: i32, %arg2: memref<1x19x256xf32, #tpu.memory_space<vmem>>, %arg3: memref<1x1x256xi32, #tpu.memory_space<vmem>>, %arg4: memref<1x19x128xf32, #tpu.memory_space<vmem>>, %arg5: memref<19x1xf32, #tpu.memory_space<vmem>>, %arg6: memref<19x1xf32, #tpu.memory_space<vmem>>, %arg7: memref<19x1xf32, #tpu.memory_space<vmem>>) attributes {dimension_semantics = [#tpu.dimension_semantics<parallel>, #tpu.dimension_semantics<arbitrary>], iteration_bounds = array<i64: 2, 1>, scalar_prefetch = 0 : i64, scratch_operands = 3 : i64, tpu.core_type = #tpu.core_type<tc>, window_params = [{transform_indices = @transform_0, window_bounds = array<i64: 1, 19, 256>}, {transform_indices = @transform_1, window_bounds = array<i64: 1, 1, 256>}, {transform_indices = @transform_2, window_bounds = array<i64: 1, 19, 128>}]} {
    %c0_i32 = arith.constant 0 : i32
    %0 = arith.cmpi eq, %arg1, %c0_i32 : i32
    %1 = arith.extui %0 : i1 to i32
    %c0_i32_0 = arith.constant 0 : i32
    %2 = arith.cmpi ne, %1, %c0_i32_0 : i32
    scf.if %2 {
      %cst_22 = arith.constant 0xFF800000 : f32
      %36 = vector.broadcast %cst_22 : f32 to vector<19x1xf32>
      %c0_23 = arith.constant 0 : index
      %c0_24 = arith.constant 0 : index
      %37 = vector.load %arg5[%c0_23, %c0_24] : memref<19x1xf32, #tpu.memory_space<vmem>>, vector<19x1xf32>
      tpu.vector_store %arg5[%c0_23, %c0_24], %36 {strides = array<i32>} : memref<19x1xf32, #tpu.memory_space<vmem>>, vector<19x1xf32>,
      %cst_25 = arith.constant 0.000000e+00 : f32
      %38 = vector.broadcast %cst_25 : f32 to vector<19x1xf32>
      %c0_26 = arith.constant 0 : index
      %c0_27 = arith.constant 0 : index
      %39 = vector.load %arg6[%c0_26, %c0_27] : memref<19x1xf32, #tpu.memory_space<vmem>>, vector<19x1xf32>
      tpu.vector_store %arg6[%c0_26, %c0_27], %38 {strides = array<i32>} : memref<19x1xf32, #tpu.memory_space<vmem>>, vector<19x1xf32>,
      %cst_28 = arith.constant 0.000000e+00 : f32
      %40 = vector.broadcast %cst_28 : f32 to vector<19x1xf32>
      %c0_29 = arith.constant 0 : index
      %c0_30 = arith.constant 0 : index
      %41 = vector.load %arg7[%c0_29, %c0_30] : memref<19x1xf32, #tpu.memory_space<vmem>>, vector<19x1xf32>
      tpu.vector_store %arg7[%c0_29, %c0_30], %40 {strides = array<i32>} : memref<19x1xf32, #tpu.memory_space<vmem>>, vector<19x1xf32>,
    } else {
    }
    %c0 = arith.constant 0 : index
    %c0_1 = arith.constant 0 : index
    %c0_2 = arith.constant 0 : index
    %3 = vector.load %arg2[%c0, %c0_1, %c0_2] : memref<1x19x256xf32, #tpu.memory_space<vmem>>, vector<1x19x256xf32>
    %4 = vector.shape_cast %3 : vector<1x19x256xf32> to vector<19x256xf32>
    %cst = arith.constant dense<0xFF800000> : vector<19xf32>
    %5 = vector.multi_reduction <maximumf>, %4, %cst [1] : vector<19x256xf32> to vector<19xf32>
    %6 = vector.shape_cast %5 : vector<19xf32> to vector<19x1xf32>
    %c0_3 = arith.constant 0 : index
    %c0_4 = arith.constant 0 : index
    %7 = vector.load %arg5[%c0_3, %c0_4] : memref<19x1xf32, #tpu.memory_space<vmem>>, vector<19x1xf32>
    %8 = arith.maximumf %7, %6 : vector<19x1xf32>
    %c0_5 = arith.constant 0 : index
    %c0_6 = arith.constant 0 : index
    %9 = vector.load %arg6[%c0_5, %c0_6] : memref<19x1xf32, #tpu.memory_space<vmem>>, vector<19x1xf32>
    %10 = arith.subf %7, %8 : vector<19x1xf32>
    %11 = math.exp %10 : vector<19x1xf32>
    %12 = arith.mulf %9, %11 : vector<19x1xf32>
    %13 = vector.broadcast %8 : vector<19x1xf32> to vector<19x256xf32>
    %14 = arith.subf %4, %13 : vector<19x256xf32>
    %15 = math.exp %14 : vector<19x256xf32>
    %cst_7 = arith.constant dense<0.000000e+00> : vector<19xf32>
    %16 = vector.multi_reduction <add>, %15, %cst_7 [1] : vector<19x256xf32> to vector<19xf32>
    %17 = vector.shape_cast %16 : vector<19xf32> to vector<19x1xf32>
    %18 = arith.addf %12, %17 : vector<19x1xf32>
    %c0_8 = arith.constant 0 : index
    %c0_9 = arith.constant 0 : index
    %19 = vector.load %arg6[%c0_8, %c0_9] : memref<19x1xf32, #tpu.memory_space<vmem>>, vector<19x1xf32>
    tpu.vector_store %arg6[%c0_8, %c0_9], %18 {strides = array<i32>} : memref<19x1xf32, #tpu.memory_space<vmem>>, vector<19x1xf32>,
    %c0_10 = arith.constant 0 : index
    %c0_11 = arith.constant 0 : index
    %20 = vector.load %arg5[%c0_10, %c0_11] : memref<19x1xf32, #tpu.memory_space<vmem>>, vector<19x1xf32>
    tpu.vector_store %arg5[%c0_10, %c0_11], %8 {strides = array<i32>} : memref<19x1xf32, #tpu.memory_space<vmem>>, vector<19x1xf32>,
    %c0_12 = arith.constant 0 : index
    %c0_13 = arith.constant 0 : index
    %c0_14 = arith.constant 0 : index
    %21 = vector.load %arg3[%c0_12, %c0_13, %c0_14] : memref<1x1x256xi32, #tpu.memory_space<vmem>>, vector<1x1x256xi32>
    %22 = vector.shape_cast %21 : vector<1x1x256xi32> to vector<1x256xi32>
    %23 = tpu.iota {dimensions = array<i32: 0>} : vector<19x256xi32>
    %24 = vector.broadcast %22 : vector<1x256xi32> to vector<19x256xi32>
    %25 = arith.cmpi eq, %24, %23 : vector<19x256xi32>
    %26 = arith.extui %25 : vector<19x256xi1> to vector<19x256xi32>
    %27 = arith.sitofp %26 : vector<19x256xi32> to vector<19x256xf32>
    %cst_15 = arith.constant dense<0xFF800000> : vector<19xf32>
    %28 = vector.multi_reduction <maximumf>, %27, %cst_15 [1] : vector<19x256xf32> to vector<19xf32>
    %29 = vector.shape_cast %28 : vector<19xf32> to vector<19x1xf32>
    %c0_16 = arith.constant 0 : index
    %c0_17 = arith.constant 0 : index
    %30 = vector.load %arg7[%c0_16, %c0_17] : memref<19x1xf32, #tpu.memory_space<vmem>>, vector<19x1xf32>
    %31 = arith.maximumf %30, %29 : vector<19x1xf32>
    %c0_18 = arith.constant 0 : index
    %c0_19 = arith.constant 0 : index
    %32 = vector.load %arg7[%c0_18, %c0_19] : memref<19x1xf32, #tpu.memory_space<vmem>>, vector<19x1xf32>
    tpu.vector_store %arg7[%c0_18, %c0_19], %31 {strides = array<i32>} : memref<19x1xf32, #tpu.memory_space<vmem>>, vector<19x1xf32>,
    %c0_i32_20 = arith.constant 0 : i32
    %33 = arith.cmpi eq, %arg1, %c0_i32_20 : i32
    %34 = arith.extui %33 : i1 to i32
    %c0_i32_21 = arith.constant 0 : i32
    %35 = arith.cmpi ne, %34, %c0_i32_21 : i32
    scf.if %35 {
      %c0_22 = arith.constant 0 : index
      %c0_23 = arith.constant 0 : index
      %36 = vector.load %arg5[%c0_22, %c0_23] : memref<19x1xf32, #tpu.memory_space<vmem>>, vector<19x1xf32>
      %c0_24 = arith.constant 0 : index
      %c0_25 = arith.constant 0 : index
      %37 = vector.load %arg6[%c0_24, %c0_25] : memref<19x1xf32, #tpu.memory_space<vmem>>, vector<19x1xf32>
      %38 = math.log %37 : vector<19x1xf32>
      %39 = arith.addf %36, %38 : vector<19x1xf32>
      %cst_26 = arith.constant -5.54517746 : f32
      %40 = vector.broadcast %cst_26 : f32 to vector<19x1xf32>
      %41 = arith.addf %39, %40 : vector<19x1xf32>
      %cst_27 = arith.constant 0.000000e+00 : f32
      %42 = vector.broadcast %cst_27 : f32 to vector<19x1xf32>
      %43 = arith.subf %42, %41 : vector<19x1xf32>
      %cst_28 = arith.constant 0.000000e+00 : f32
      %44 = vector.broadcast %cst_28 : f32 to vector<19x1xf32>
      %45 = arith.maximumf %43, %44 : vector<19x1xf32>
      %46 = math.absf %43 : vector<19x1xf32>
      %cst_29 = arith.constant 0.000000e+00 : f32
      %47 = vector.broadcast %cst_29 : f32 to vector<19x1xf32>
      %48 = arith.subf %47, %46 : vector<19x1xf32>
      %49 = math.exp %48 : vector<19x1xf32>
      %cst_30 = arith.constant 1.000000e+00 : f32
      %50 = vector.broadcast %cst_30 : f32 to vector<19x1xf32>
      %51 = arith.addf %50, %49 : vector<19x1xf32>
      %52 = math.log %51 : vector<19x1xf32>
      %53 = arith.addf %45, %52 : vector<19x1xf32>
      %cst_31 = arith.constant 0.000000e+00 : f32
      %54 = vector.broadcast %cst_31 : f32 to vector<19x1xf32>
      %55 = arith.subf %54, %53 : vector<19x1xf32>
      %cst_32 = arith.constant -1.000000e+02 : f32
      %56 = vector.broadcast %cst_32 : f32 to vector<19x1xf32>
      %57 = arith.maximumf %55, %56 : vector<19x1xf32>
      %cst_33 = arith.constant 0.000000e+00 : f32
      %58 = vector.broadcast %cst_33 : f32 to vector<19x1xf32>
      %59 = arith.maximumf %41, %58 : vector<19x1xf32>
      %60 = math.absf %41 : vector<19x1xf32>
      %cst_34 = arith.constant 0.000000e+00 : f32
      %61 = vector.broadcast %cst_34 : f32 to vector<19x1xf32>
      %62 = arith.subf %61, %60 : vector<19x1xf32>
      %63 = math.exp %62 : vector<19x1xf32>
      %cst_35 = arith.constant 1.000000e+00 : f32
      %64 = vector.broadcast %cst_35 : f32 to vector<19x1xf32>
      %65 = arith.addf %64, %63 : vector<19x1xf32>
      %66 = math.log %65 : vector<19x1xf32>
      %67 = arith.addf %59, %66 : vector<19x1xf32>
      %cst_36 = arith.constant 0.000000e+00 : f32
      %68 = vector.broadcast %cst_36 : f32 to vector<19x1xf32>
      %69 = arith.subf %68, %67 : vector<19x1xf32>
      %cst_37 = arith.constant -1.000000e+02 : f32
      %70 = vector.broadcast %cst_37 : f32 to vector<19x1xf32>
      %71 = arith.maximumf %69, %70 : vector<19x1xf32>
      %c0_38 = arith.constant 0 : index
      %c0_39 = arith.constant 0 : index
      %72 = vector.load %arg7[%c0_38, %c0_39] : memref<19x1xf32, #tpu.memory_space<vmem>>, vector<19x1xf32>
      %73 = arith.mulf %72, %57 : vector<19x1xf32>
      %cst_40 = arith.constant 1.000000e+00 : f32
      %74 = vector.broadcast %cst_40 : f32 to vector<19x1xf32>
      %75 = arith.subf %74, %72 : vector<19x1xf32>
      %76 = arith.mulf %75, %71 : vector<19x1xf32>
      %77 = arith.addf %73, %76 : vector<19x1xf32>
      %cst_41 = arith.constant 0.000000e+00 : f32
      %78 = vector.broadcast %cst_41 : f32 to vector<19x1xf32>
      %79 = arith.subf %78, %77 : vector<19x1xf32>
      %80 = vector.shape_cast %79 : vector<19x1xf32> to vector<1x19x1xf32>
      %81 = vector.shape_cast %80 : vector<1x19x1xf32> to vector<1x19x1xf32>
      %82 = vector.broadcast %81 : vector<1x19x1xf32> to vector<1x19x128xf32>
      %c0_42 = arith.constant 0 : index
      %c0_43 = arith.constant 0 : index
      %c0_44 = arith.constant 0 : index
      %83 = vector.load %arg4[%c0_42, %c0_43, %c0_44] : memref<1x19x128xf32, #tpu.memory_space<vmem>>, vector<1x19x128xf32>
      tpu.vector_store %arg4[%c0_42, %c0_43, %c0_44], %82 {strides = array<i32>} : memref<1x19x128xf32, #tpu.memory_space<vmem>>, vector<1x19x128xf32>,
    } else {
    }
    return
  }
  func.func @transform_0(%arg0: i32, %arg1: i32) -> (i32, i32, i32) {
    %c0_i32 = arith.constant 0 : i32
    %c0_i32_0 = arith.constant 0 : i32
    return %arg0, %c0_i32, %arg1 : i32, i32, i32
  }
  func.func @transform_1(%arg0: i32, %arg1: i32) -> (i32, i32, i32) {
    %c0_i32 = arith.constant 0 : i32
    %c0_i32_0 = arith.constant 0 : i32
    return %arg0, %c0_i32, %arg1 : i32, i32, i32
  }
  func.func @transform_2(%arg0: i32, %arg1: i32) -> (i32, i32, i32) {
    %c0_i32 = arith.constant 0 : i32
    %c0_i32_0 = arith.constant 0 : i32
    %c0_i32_1 = arith.constant 0 : i32
    return %arg0, %c0_i32, %c0_i32_0 : i32, i32, i32
  }
}

</mosaic_0001>

<bundles_post_ra>
// kernel: tpu_custom_call.1
= control target key start
LH: loop header
LB: loop body
LE: loop exit
PB: predicated region body
PF: predicated region fallthrough
CT: control target
= control target key end

     0   :  { %s707_s9 = smov 0   ;;  %s709_s10 = smov 0   ;;  %s850_s0 = inlined_call_operand.vmem [shape: f32[2,19,256], index: 0, kind: input, shape index: {}]   ;;  %s851_s1 = inlined_call_operand.vmem [shape: s32[2,1,256], index: 1, kind: input, shape index: {}]   ;;  %s852_s2 = inlined_call_operand.vmem [shape: f32[2,19,128], index: 2, kind: output, shape index: {}]  }
   0x1   :  { %s711_s11 = smov 0  }
   0x2 LB: > { %s24_s12 = sadd.s32 1, %s683_s10  ;;  %p573_p0 = scmp.ge.s32.totalorder %s687_s11, 1  ;;  %s687_s11 = sphi %s711_s11, %s12_s11   ;;  %s683_s10 = sphi %s709_s10, %s854_s10   ;;  %s679_s9 = sphi %s707_s9, %s853_s9  }
   0x3   : > { %p26_p1 = scmp.ge.s32.totalorder %s24_s12, 2  ;;  %p147_p2 = scmp.lt.s32.totalorder %s687_s11, 3 }
   0x5   : > { %s856_s12 = smov (%p26_p1, %s24_s12), 0  ;;  %p148_p3 = pnand %p573_p0, %p147_p2 }
   0x6   : > { %p182_p4 = scmp.lt.s32.totalorder (!%p148_p3), %s679_s9, 1 }
   0x7   : > { %151 = sbr.rel (%p148_p3) target bundleno = 562 (0x232), region = 28 }
   0xc   : > { %vm212_vm0 = vcmask 2048   ;;  %v689_v0 = vmov -inf   ;;  %s858_s9 = smov (!%p182_p4, %s679_s9), 1  ;;  %vm232_vm1 = vcmask 1042432   ;;  %vm209_vm2 = vcmask 7168  }
   0xd   : > { %213 = vst.msk [vmem:[#allocation2 + $0x10] sm:$0x7] %vm212_vm0, %v689_v0  ;;  %s585_s13 = smul.u32 48, %s858_s9  ;;  %v690_v12 = vmov 0   ;;  %v691_v13 = vmov 0.0   ;;  %s575_s17 = sshll.u32 %s858_s9, 1  ;;  %v315_v29 = vlaneseq }
   0xe   : > { %210 = vst.msk [vmem:[#allocation2] sm:$0xff] %vm209_vm2, %v689_v0  ;;  %614 = vset.pattern.permute.xlu1 %v690_v12  ;;  %615 = vset.pattern.permute.xlu2 %v690_v12  ;;  %s198_s20 = scalar_lea.vmem %s851_s1, %s575_s17  ;;  %s586_s21 = smul.u32 24, %s858_s9 }
   0xf   : > { %s189_s16 = scalar_lea.vmem %s850_s0, %s585_s13  ;;  %211 = vst.msk [vmem:[#allocation2 + $0x8] sm:$0xff] %vm209_vm2, %v689_v0  ;;  %616 = vset.pattern.permute.xlu0 %v690_v12  ;;  %v314_v32 = vld [vmem:[%s198_s20] sm:$0x3]  ;;  %v316_v33 = vshrl.u32 %v315_v29, 7 }
  0x10   : > { %v732_v1 = vld [vmem:[%s189_s16 + $0x20] sm:$0x7]  ;;  %v734_v2 = vld [vmem:[%s189_s16 + $0x28] sm:$0x7]  ;;  %v740_v5 = vld [vmem:[%s189_s16 + $0x10] sm:$0xff]  ;;  %214 = vst.msk [vmem:[#allocation3] sm:$0xff] %vm209_vm2, %v691_v13  ;;  %s204_s24 = scalar_lea.vmem %s852_s2, %s586_s21 }
  0x11   : > { %v233_v3 = vsel %vm232_vm1, %v732_v1, -inf  ;;  %v234_v4 = vsel %vm232_vm1, %v734_v2, -inf  ;;  %v742_v6 = vld [vmem:[%s189_s16 + $0x18] sm:$0xff]  ;;  %v220_v9 = vld [vmem:[%s189_s16] sm:$0xff]  ;;  %v221_v10 = vld [vmem:[%s189_s16 + $0x8] sm:$0xff]  ;;  %215 = vst.msk [vmem:[#allocation3 + $0x8] sm:$0xff] %vm209_vm2, %v691_v13 }
  0x12   : > { %v235_v7 = vmax.f32 %v233_v3, %v234_v4  ;;  %v229_v8 = vmax.f32 %v740_v5, %v742_v6  ;;  %v226_v11 = vmax.f32 %v220_v9, %v221_v10  ;;  %216 = vst.msk [vmem:[#allocation3 + $0x10] sm:$0x7] %vm212_vm0, %v691_v13  ;;  %v319_v35 = vperm.slane %v314_v32, 0 }
  0x13   : > { %217 = vst.msk [vmem:[#allocation4] sm:$0xff] %vm209_vm2, %v691_v13  ;;  %v320_v36 = vperm.slane %v314_v32, 1  ;;  %v317_v37 = vadd.s32 8, %v316_v33  ;;  %v318_v61 = vadd.s32 16, %v316_v33 }
  0x14   : > { %236 = vmax.xlane.f32.xlu0 %v235_v7  ;;  %230 = vmax.xlane.f32.xlu1 %v229_v8  ;;  %218 = vst.msk [vmem:[#allocation4 + $0x8] sm:$0xff] %vm209_vm2, %v691_v13  ;;  %v760_v14 = vld [vmem:[#allocation2 + $0x10] sm:$0x7]  ;;  %vm321_vm5 = vcmp.eq.s32.totalorder %v319_v35, %v316_v33 }
  0x15   : > { %219 = vst.msk [vmem:[#allocation4 + $0x10] sm:$0x7] %vm212_vm0, %v691_v13  ;;  %v779_v22 = vld [vmem:[#allocation2] sm:$0xff]  ;;  %vm323_vm3 = vcmp.eq.s32.totalorder %v319_v35, %v317_v37  ;;  %vm324_vm4 = vcmp.eq.s32.totalorder %v320_v36, %v317_v37  ;;  %vm322_vm6 = vcmp.eq.s32.totalorder %v320_v36, %v316_v33  ;;  %v577_v62 = vsel %vm321_vm5, 1.0, %v691_v13 }
  0x16   : > { %v762_v15 = vld [vmem:[#allocation2 + $0x8] sm:$0xff]  ;;  %v579_v43 = vsel %vm323_vm3, 1.0, %v691_v13  ;;  %v580_v44 = vsel %vm324_vm4, 1.0, %v691_v13  ;;  %v578_v63 = vsel %vm322_vm6, 1.0, %v691_v13  ;;  %vm325_vm7 = vcmp.eq.s32.totalorder %v319_v35, %v318_v61 }
  0x17   : > { %v342_v46 = vmax.f32 %v579_v43, %v580_v44  ;;  %vm326_vm8 = vcmp.eq.s32.totalorder %v320_v36, %v318_v61  ;;  %v339_v0 = vmax.f32 %v577_v62, %v578_v63 }
  0x1c   : > { %227 = vmax.xlane.f32.xlu0 %v226_v11 }
  0x87   : > { %v237_v16 = vpop.xlane.xlu0 %236  ;;  %v231_v17 = vpop.xlane.xlu1 %230 }
  0x88   : > { %v765_v18 = vmax.f32 %v760_v14, %v237_v16  ;;  %v768_v19 = vmax.f32 %v762_v15, %v231_v17 }
  0x8a   : > { %v249_v20 = vsub.f32 %v760_v14, %v765_v18  ;;  %313 = vst.msk [vmem:[#allocation2 + $0x10] sm:$0x7] %vm212_vm0, %v765_v18  ;;  %271 = vperm.xlu1 %614, %v765_v18   ;;  %v248_v21 = vsub.f32 %v762_v15, %v768_v19  ;;  %v245_v15 = vld [vmem:[#allocation3 + $0x8] sm:$0xff] }
  0x8b   : > { %312 = vst.msk [vmem:[#allocation2 + $0x8] sm:$0xff] %vm209_vm2, %v768_v19 }
  0x8c   : > { %v252_v7 = vmul.f32 1.442695, %v248_v21 }
  0x8f   : > { %v228_v23 = vpop.xlane.xlu0 %227 }
  0x90   : > { %v782_v24 = vmax.f32 %v779_v22, %v228_v23 }
  0x91   : > { %v364_v63 = vld [vmem:[#allocation2 + $0x10] sm:$0x7] }
  0x92   : > { %v247_v25 = vsub.f32 %v779_v22, %v782_v24  ;;  %311 = vst.msk [vmem:[#allocation2] sm:$0xff] %vm209_vm2, %v782_v24  ;;  %261 = vperm.xlu2 %615, %v782_v24   ;;  %v254_v22 = vmul.f32 1.442695, %v249_v20 }
  0x99   : > { %v362_v20 = vld [vmem:[#allocation2] sm:$0xff] }
  0x9a   : > { %266 = vperm.xlu2 %615, %v768_v19  }
  0xb4   : > { %343 = vmax.xlane.f32.xlu1 %v342_v46  ;;  %v363_v46 = vld [vmem:[#allocation2 + $0x8] sm:$0xff] }
  0xec   : > { %v262_v26 = vpop.permute.xlu2 %261 }
  0xed   : > { %v274_v27 = vsub.f32 %v220_v9, %v262_v26  ;;  %v275_v28 = vsub.f32 %v221_v10, %v262_v26  ;;  %v244_v9 = vld [vmem:[#allocation3] sm:$0xff] }
  0xee   : > { %v351_v10 = vld [vmem:[#allocation4 + $0x8] sm:$0xff] }
  0xef   : > { %v280_v30 = vmul.f32 1.442695, %v274_v27  ;;  %v282_v31 = vmul.f32 1.442695, %v275_v28  ;;  %v246_v27 = vld [vmem:[#allocation3 + $0x10] sm:$0x7] }
  0xf1   : > { %617 = vpow2.f32 %v280_v30 }
  0xf2   : > { %619 = vpow2.f32 %v282_v31 }
  0xf4   : > { %v267_v34 = vpop.permute.xlu2 %266 }
  0xf5   : > { %v276_v38 = vsub.f32 %v740_v5, %v267_v34  ;;  %v277_v39 = vsub.f32 %v742_v6, %v267_v34  ;;  %v250_v6 = vmul.f32 1.442695, %v247_v25  ;;  %v350_v34 = vld [vmem:[#allocation4] sm:$0xff] }
  0xf7   : > { %v618_v40 = vpop.eup %617  ;;  %v284_v41 = vmul.f32 1.442695, %v276_v38  ;;  %v286_v42 = vmul.f32 1.442695, %v277_v39 }
  0xf8   : > { %v620_v45 = vpop.eup %619 }
  0xf9   : > { %621 = vpow2.f32 %v284_v41  ;;  %v292_v47 = vadd.f32 %v620_v45, %v618_v40 }
  0xfa   : > { %623 = vpow2.f32 %v286_v42 }
  0xfb   : > { %293 = vadd.xlane.f32.xlu0 %v292_v47 }
  0xfc   : > { %v272_v48 = vpop.permute.xlu1 %271 }
  0xfd   : > { %v278_v49 = vsub.f32 %v732_v1, %v272_v48  ;;  %v279_v50 = vsub.f32 %v734_v2, %v272_v48  ;;  %v581_v1 = vsel %vm325_vm7, 1.0, %v691_v13  ;;  %v582_v2 = vsel %vm326_vm8, 1.0, %v691_v13 }
  0xfe   : > { %v345_v3 = vsel %vm232_vm1, %v581_v1, -inf  ;;  %v346_v4 = vsel %vm232_vm1, %v582_v2, -inf }
  0xff   : > { %v622_v51 = vpop.eup %621  ;;  %v288_v52 = vmul.f32 1.442695, %v278_v49  ;;  %v290_v53 = vmul.f32 1.442695, %v279_v50  ;;  %v347_v5 = vmax.f32 %v345_v3, %v346_v4  ;;  %v352_v49 = vld [vmem:[#allocation4 + $0x10] sm:$0x7] }
 0x100   : > { %v624_v54 = vpop.eup %623 }
 0x101   : > { %625 = vpow2.f32 %v288_v52  ;;  %v295_v55 = vadd.f32 %v624_v54, %v622_v51 }
 0x102   : > { %627 = vpow2.f32 %v290_v53 }
 0x103   : > { %296 = vadd.xlane.f32.xlu2 %v295_v55  ;;  %629 = vpow2.f32 %v250_v6 }
 0x104   : > { %631 = vpow2.f32 %v252_v7 }
 0x105   : > { %633 = vpow2.f32 %v254_v22 }
 0x107   : > { %v626_v56 = vpop.eup %625 }
 0x108   : > { %v628_v57 = vpop.eup %627  ;;  %v298_v58 = vsel %vm232_vm1, %v626_v56, 0.0 }
 0x109   : > { %v299_v59 = vsel %vm232_vm1, %v628_v57, 0.0  ;;  %v630_v8 = vpop.eup %629 }
 0x10a   : > { %v300_v60 = vadd.f32 %v299_v59, %v298_v58  ;;  %v256_v11 = vmul.f32 %v630_v8, %v244_v9  ;;  %v632_v23 = vpop.eup %631 }
 0x10b   : > { %v257_v19 = vmul.f32 %v632_v23, %v245_v15  ;;  %v634_v26 = vpop.eup %633 }
 0x10c   : > { %301 = vadd.xlane.f32.xlu0 %v300_v60  ;;  %v258_v28 = vmul.f32 %v634_v26, %v246_v27 }
 0x114   : > { %340 = vmax.xlane.f32.xlu0 %v339_v0 }
 0x11c   : > { %348 = vmax.xlane.f32.xlu0 %v347_v5 }
 0x127   : > { %v344_v12 = vpop.xlane.xlu1 %343 }
 0x128   : > { %v354_v16 = vmax.f32 %v351_v10, %v344_v12 }
 0x12a   : > { %357 = vst.msk [vmem:[#allocation4 + $0x8] sm:$0xff] %vm209_vm2, %v354_v16 }
 0x16e   : > { %v294_v13 = vpop.xlane.xlu0 %293 }
 0x16f   : > { %v303_v17 = vadd.f32 %v294_v13, %v256_v11 }
 0x171   : > { %307 = vst.msk [vmem:[#allocation3] sm:$0xff] %vm209_vm2, %v303_v17 }
 0x176   : > { %v297_v21 = vpop.xlane.xlu2 %296 }
 0x177   : > { %v304_v24 = vadd.f32 %v297_v21, %v257_v19 }
 0x178   : > { %v365_v25 = vld [vmem:[#allocation3] sm:$0xff] }
 0x179   : > { %308 = vst.msk [vmem:[#allocation3 + $0x8] sm:$0xff] %vm209_vm2, %v304_v24  ;;  %635 = vlog2.f32 %v365_v25 }
 0x17f   : > { %v636_v29 = vpop.eup %635  ;;  %v302_v30 = vpop.xlane.xlu0 %301 }
 0x180   : > { %v305_v31 = vadd.f32 %v302_v30, %v258_v28  ;;  %v369_v14 = vmul.f32 0.6931472, %v636_v29  ;;  %v366_v18 = vld [vmem:[#allocation3 + $0x8] sm:$0xff] }
 0x181   : > { %637 = vlog2.f32 %v366_v18 }
 0x182   : > { %310 = vst.msk [vmem:[#allocation3 + $0x10] sm:$0x7] %vm212_vm0, %v305_v31  ;;  %v374_v32 = vadd.f32 %v369_v14, %v362_v20 }
 0x184   : > { %v377_v33 = vadd.f32 -5.5451775, %v374_v32 }
 0x186   : > { %v380_v35 = vsub.f32 0.0, %v377_v33  ;;  %v419_v36 = vand.u32 2147483647, %v377_v33  ;;  %v416_v11 = vmax.f32 %v377_v33, 0.0 }
 0x187   : > { %v638_v37 = vpop.eup %637  ;;  %v341_v38 = vpop.xlane.xlu0 %340 }
 0x188   : > { %v353_v39 = vmax.f32 %v350_v34, %v341_v38  ;;  %v386_v40 = vand.u32 2147483647, %v380_v35  ;;  %v422_v41 = vsub.f32 0.0, %v419_v36  ;;  %v371_v42 = vmul.f32 0.6931472, %v638_v37 }
 0x189   : > { %v367_v43 = vld [vmem:[#allocation3 + $0x10] sm:$0x7]  ;;  %v383_v22 = vmax.f32 %v380_v35, 0.0 }
 0x18a   : > { %356 = vst.msk [vmem:[#allocation4] sm:$0xff] %vm209_vm2, %v353_v39  ;;  %v389_v44 = vsub.f32 0.0, %v386_v40  ;;  %v425_v45 = vmul.f32 1.442695, %v422_v41  ;;  %639 = vlog2.f32 %v367_v43  ;;  %v375_v47 = vadd.f32 %v371_v42, %v363_v46 }
 0x18c   : > { %v392_v48 = vmul.f32 1.442695, %v389_v44  ;;  %641 = vpow2.f32 %v425_v45  ;;  %v822_v50 = vadd.f32 -5.5451775, %v375_v47  ;;  %v450_v44 = vld [vmem:[#allocation4 + $0x8] sm:$0xff] }
 0x18e   : > { %643 = vpow2.f32 %v392_v48  ;;  %v381_v52 = vsub.f32 0.0, %v822_v50  ;;  %v420_v53 = vand.u32 2147483647, %v822_v50  ;;  %v417_v36 = vmax.f32 %v822_v50, 0.0 }
 0x18f   : > { %v349_v51 = vpop.xlane.xlu0 %348 }
 0x190   : > { %v640_v54 = vpop.eup %639  ;;  %v355_v55 = vmax.f32 %v352_v49, %v349_v51  ;;  %v387_v56 = vand.u32 2147483647, %v381_v52  ;;  %v423_v57 = vsub.f32 0.0, %v420_v53  ;;  %v384_v41 = vmax.f32 %v381_v52, 0.0 }
 0x191   : > { %v373_v59 = vmul.f32 0.6931472, %v640_v54  ;;  %v449_v25 = vld [vmem:[#allocation4] sm:$0xff]  ;;  %v456_v51 = vsub.f32 1.0, %v450_v44 }
 0x192   : > { %v642_v58 = vpop.eup %641  ;;  %358 = vst.msk [vmem:[#allocation4 + $0x10] sm:$0x7] %vm212_vm0, %v355_v55  ;;  %v390_v61 = vsub.f32 0.0, %v387_v56  ;;  %v427_v62 = vmul.f32 1.442695, %v423_v57  ;;  %v455_v31 = vsub.f32 1.0, %v449_v25 }
 0x193   : > { %v431_v60 = vadd.f32 1.0, %v642_v58  ;;  %v376_v1 = vadd.f32 %v373_v59, %v364_v63 }
 0x194   : > { %v644_v0 = vpop.eup %643  ;;  %v394_v3 = vmul.f32 1.442695, %v390_v61 }
 0x195   : > { %v398_v2 = vadd.f32 1.0, %v644_v0  ;;  %645 = vlog2.f32 %v431_v60  ;;  %v829_v4 = vadd.f32 -5.5451775, %v376_v1 }
 0x196   : > { %647 = vpow2.f32 %v427_v62 }
 0x197   : > { %649 = vlog2.f32 %v398_v2  ;;  %v382_v5 = vsub.f32 0.0, %v829_v4  ;;  %v421_v6 = vand.u32 2147483647, %v829_v4  ;;  %v418_v55 = vmax.f32 %v829_v4, 0.0 }
 0x198   : > { %651 = vpow2.f32 %v394_v3 }
 0x199   : > { %v388_v7 = vand.u32 2147483647, %v382_v5  ;;  %v424_v8 = vsub.f32 0.0, %v421_v6  ;;  %v385_v58 = vmax.f32 %v382_v5, 0.0  ;;  %v451_v61 = vld [vmem:[#allocation4 + $0x10] sm:$0x7] }
 0x19a   : > { %v457_v6 = vsub.f32 1.0, %v451_v61 }
 0x19b   : > { %v646_v9 = vpop.eup %645  ;;  %v391_v13 = vsub.f32 0.0, %v388_v7  ;;  %v429_v16 = vmul.f32 1.442695, %v424_v8 }
 0x19c   : > { %v648_v10 = vpop.eup %647  ;;  %v435_v12 = vmul.f32 0.6931472, %v646_v9 }
 0x19d   : > { %v650_v17 = vpop.eup %649  ;;  %v432_v23 = vadd.f32 1.0, %v648_v10  ;;  %v396_v24 = vmul.f32 1.442695, %v391_v13  ;;  %653 = vpow2.f32 %v429_v16 }
 0x19e   : > { %v652_v15 = vpop.eup %651  ;;  %v402_v19 = vmul.f32 0.6931472, %v650_v17  ;;  %v440_v21 = vadd.f32 %v435_v12, %v416_v11 }
 0x19f   : > { %v399_v26 = vadd.f32 1.0, %v652_v15  ;;  %655 = vlog2.f32 %v432_v23 }
 0x1a0   : > { %v407_v27 = vadd.f32 %v402_v19, %v383_v22  ;;  %v443_v28 = vsub.f32 0.0, %v440_v21  ;;  %657 = vpow2.f32 %v396_v24 }
 0x1a1   : > { %659 = vlog2.f32 %v399_v26 }
 0x1a2   : > { %v410_v29 = vsub.f32 0.0, %v407_v27  ;;  %v446_v30 = vmax.f32 %v443_v28, -100.0 }
 0x1a3   : > { %v654_v14 = vpop.eup %653 }
 0x1a4   : > { %v413_v18 = vmax.f32 %v410_v29, -100.0  ;;  %v433_v32 = vadd.f32 1.0, %v654_v14  ;;  %v458_v35 = vmul.f32 %v455_v31, %v446_v30 }
 0x1a5   : > { %v656_v20 = vpop.eup %655 }
 0x1a6   : > { %v658_v33 = vpop.eup %657  ;;  %v452_v34 = vmul.f32 %v449_v25, %v413_v18  ;;  %v437_v37 = vmul.f32 0.6931472, %v656_v20  ;;  %661 = vlog2.f32 %v433_v32 }
 0x1a7   : > { %v660_v38 = vpop.eup %659  ;;  %v400_v39 = vadd.f32 1.0, %v658_v33 }
 0x1a8   : > { %v461_v40 = vadd.f32 %v458_v35, %v452_v34  ;;  %v404_v42 = vmul.f32 0.6931472, %v660_v38  ;;  %v441_v43 = vadd.f32 %v437_v37, %v417_v36 }
 0x1a9   : > { %663 = vlog2.f32 %v400_v39 }
 0x1aa   : > { %v464_v45 = vsub.f32 0.0, %v461_v40  ;;  %v408_v46 = vadd.f32 %v404_v42, %v384_v41  ;;  %v444_v47 = vsub.f32 0.0, %v441_v43 }
 0x1ac   : > { %469 = vperm.xlu0 %616, %v464_v45   ;;  %v411_v48 = vsub.f32 0.0, %v408_v46  ;;  %v447_v49 = vmax.f32 %v444_v47, -100.0  ;;  %v662_v53 = vpop.eup %661 }
 0x1ad   : > { %v439_v56 = vmul.f32 0.6931472, %v662_v53 }
 0x1ae   : > { %v414_v54 = vmax.f32 %v411_v48, -100.0  ;;  %v459_v52 = vmul.f32 %v456_v51, %v447_v49 }
 0x1af   : > { %v664_v57 = vpop.eup %663  ;;  %v442_v60 = vadd.f32 %v439_v56, %v418_v55 }
 0x1b0   : > { %v453_v50 = vmul.f32 %v450_v44, %v414_v54  ;;  %v406_v59 = vmul.f32 0.6931472, %v664_v57 }
 0x1b1   : > { %v445_v0 = vsub.f32 0.0, %v442_v60 }
 0x1b2   : > { %v462_v62 = vadd.f32 %v459_v52, %v453_v50  ;;  %v409_v63 = vadd.f32 %v406_v59, %v385_v58 }
 0x1b3   : > { %v448_v3 = vmax.f32 %v445_v0, -100.0 }
 0x1b4   : > { %v465_v1 = vsub.f32 0.0, %v462_v62  ;;  %v412_v2 = vsub.f32 0.0, %v409_v63 }
 0x1b5   : > { %v460_v4 = vmul.f32 %v457_v6, %v448_v3 }
 0x1b6   : > { %474 = vperm.xlu2 %615, %v465_v1   ;;  %v415_v7 = vmax.f32 %v412_v2, -100.0 }
 0x1b8   : > { %v454_v8 = vmul.f32 %v451_v61, %v415_v7 }
 0x1ba   : > { %v463_v9 = vadd.f32 %v460_v4, %v454_v8 }
 0x1bc   : > { %v466_v10 = vsub.f32 0.0, %v463_v9 }
 0x1be   : > { %479 = vperm.xlu1 %614, %v466_v10  }
 0x210   : > { %v475_v5 = vpop.permute.xlu2 %474 }
 0x211   : > { %483 = vst [vmem:[%s204_s24 + $0x8] sm:$0xff] %v475_v5 }
 0x21e   : > { %v470_v11 = vpop.permute.xlu0 %469 }
 0x21f   : > { %482 = vst [vmem:[%s204_s24] sm:$0xff] %v470_v11 }
 0x230   : > { %v480_v12 = vpop.permute.xlu1 %479 }
 0x231   : > { %484 = vst [vmem:[%s204_s24 + $0x10] sm:$0x7] %v480_v12 }
 0x232 PF: > { %s12_s11 = sadd.s32 1, %s687_s11   ;;  %s853_s9 = smov %s683_s10 }
 0x233   : > { %p9_p5 = scmp.ge.s32.totalorder %s12_s11, 4   ;;  %s854_s10 = smov %s856_s12 }
 0x235   :  { %11 = sbr.rel (!%p9_p5) target bundleno = 2 (0x2), region = 69 }

</bundles_post_ra>
